<compile_context>
chip_gen: v6e
topology: v6e:2x2x1
jax: 0.10.0
libtpu: 0.0.40
codegen_flags: <defaults>
</compile_context>

<pallas_src>
import math

import jax
import jax.numpy as jnp
from jax.experimental import pallas as pl
from jax.experimental.pallas import tpu as pltpu


_LANE = 128
_SUBLANE = 8
_TARGET_BLOCK_BYTES = 2 * 1024 * 1024  # ~2 MiB per x/out block


def _pos_enc_kernel(x_ref, pe_ref, o_ref):
    # x_ref : (Bt, TC) tile of the flattened (B, S*D) input
    # pe_ref: (1, TC)  tile of the flattened positional-encoding table (f32)
    # o_ref : (Bt, TC)
    x = x_ref[...].astype(jnp.float32)      # add in f32 (v5e has no bf16 VPU)
    pe = pe_ref[...]                        # broadcasts over the Bt sublane rows
    o_ref[...] = (x + pe).astype(o_ref.dtype)


def make_pe_table(seq_len: int, d_model: int) -> jnp.ndarray:
    """Build the sinusoidal table exactly like the PyTorch __init__ (plain JAX glue)."""
    position = jnp.arange(seq_len, dtype=jnp.float32)[:, None]               # (S, 1)
    div_term = jnp.exp(
        jnp.arange(0, d_model, 2, dtype=jnp.float32) * (-math.log(10000.0) / d_model)
    )                                                                        # (ceil(D/2),)
    angles = position * div_term                                             # (S, ceil(D/2))
    pe = jnp.zeros((seq_len, d_model), dtype=jnp.float32)
    pe = pe.at[:, 0::2].set(jnp.sin(angles))
    pe = pe.at[:, 1::2].set(jnp.cos(angles[:, : d_model // 2]))              # odd-D safe
    return pe


def _choose_block(batch: int, flat: int, itemsize: int):
    """Pick (Bt, TC) block dims: big (~2 MiB), sublane(8)/lane(128)-aligned."""
    target = max(_LANE, _TARGET_BLOCK_BYTES // itemsize)   # elements per block
    if batch * flat <= target:
        return batch, flat                                  # whole array in one block
    if _SUBLANE * flat <= target:
        tc = flat                                           # full lane extent
    else:
        tc = max(_LANE, (target // _SUBLANE) // _LANE * _LANE)
    bt = max(_SUBLANE, (target // tc) // _SUBLANE * _SUBLANE)
    return min(bt, batch), tc


def positional_encoding(x: jnp.ndarray, pe: jnp.ndarray, *,
                        min_pallas_elements: int = 1 << 15) -> jnp.ndarray:
    """x: (B, S, D); pe: (seq_len, D) float32 with seq_len >= S.

    Returns x + pe[:S] broadcast over batch (eval-mode dropout == identity).
    """
    B, S, D = x.shape
    pe_flat = pe[:S, :].astype(jnp.float32).reshape(1, S * D)

    # Tiny inputs: let XLA fuse the add; a pallas_call launch is strictly slower.
    if x.size < min_pallas_elements:
        return (x.astype(jnp.float32) + pe_flat.reshape(1, S, D)).astype(x.dtype)

    F = S * D
    x2 = x.reshape(B, F)
    Bt, TC = _choose_block(B, F, x.dtype.itemsize)
    # Columns outer, batch inner -> pe tile index is constant along the inner
    # axis and stays resident in VMEM across batch steps.
    grid = (pl.cdiv(F, TC), pl.cdiv(B, Bt))

    out = pl.pallas_call(
        _pos_enc_kernel,
        out_shape=jax.ShapeDtypeStruct((B, F), x.dtype),
        grid_spec=pltpu.PrefetchScalarGridSpec(
            num_scalar_prefetch=0,
            grid=grid,
            in_specs=[
                pl.BlockSpec((Bt, TC), lambda c, b: (b, c)),
                pl.BlockSpec((1, TC), lambda c, b: (0, c)),
            ],
            out_specs=pl.BlockSpec((Bt, TC), lambda c, b: (b, c)),
        ),
        input_output_aliases={0: 0},                 # write the sum in place of x
        compiler_params=pltpu.CompilerParams(
            dimension_semantics=("parallel", "parallel"),  # v7x: shard across 2 TCs
            vmem_limit_bytes=32 * 1024 * 1024,
        ),
    )(x2, pe_flat)
    return out.reshape(B, S, D)


if __name__ == "__main__":
    # Module hyper-params (deterministic, in-script)
    d_model = 32
    seq_len = 8
    batch = 2
    dropout_p = 0.1  # eval-mode dropout == identity

    key = jax.random.PRNGKey(0)
    x = jax.random.normal(key, (batch, seq_len, d_model), dtype=jnp.float32)
    pe = make_pe_table(seq_len, d_model)

    # Reference first: x is donated into the kernel via input_output_aliases,
    # so it is not used after the pallas_call.
    ref = x + pe[None, :seq_len, :]
    ref = jax.block_until_ready(ref)

    # Force the Pallas path (the default threshold would route this tiny shape
    # to the fused XLA add, per the perf guidance).
    out = positional_encoding(x, pe, min_pallas_elements=0)
    out = jax.block_until_ready(out)

    assert out.shape == (batch, seq_len, d_model)
    assert jnp.allclose(out, ref, atol=1e-6), "mismatch vs reference"
    print("KERNEL_OK")
</pallas_src>

<mosaic_0001>
module attributes {stable_mosaic.version = 11 : i64} {
  func.func @_pos_enc_kernel(%arg0: i32, %arg1: i32, %arg2: memref<2x256xf32, #tpu.memory_space<vmem>>, %arg3: memref<1x256xf32, #tpu.memory_space<vmem>>, %arg4: memref<2x256xf32, #tpu.memory_space<vmem>>) attributes {dimension_semantics = [#tpu.dimension_semantics<parallel>, #tpu.dimension_semantics<parallel>], iteration_bounds = array<i64: 1, 1>, scalar_prefetch = 0 : i64, scratch_operands = 0 : i64, tpu.core_type = #tpu.core_type<tc>, window_params = [{transform_indices = @transform_0, window_bounds = array<i64: 2, 256>}, {transform_indices = @transform_1, window_bounds = array<i64: 1, 256>}, {transform_indices = @transform_2, window_bounds = array<i64: 2, 256>}]} {
    %c0 = arith.constant 0 : index
    %c0_0 = arith.constant 0 : index
    %0 = vector.load %arg2[%c0, %c0_0] : memref<2x256xf32, #tpu.memory_space<vmem>>, vector<2x256xf32>
    %c0_1 = arith.constant 0 : index
    %c0_2 = arith.constant 0 : index
    %1 = vector.load %arg3[%c0_1, %c0_2] : memref<1x256xf32, #tpu.memory_space<vmem>>, vector<1x256xf32>
    %2 = vector.broadcast %1 : vector<1x256xf32> to vector<2x256xf32>
    %3 = arith.addf %0, %2 : vector<2x256xf32>
    %c0_3 = arith.constant 0 : index
    %c0_4 = arith.constant 0 : index
    %4 = vector.load %arg4[%c0_3, %c0_4] : memref<2x256xf32, #tpu.memory_space<vmem>>, vector<2x256xf32>
    tpu.vector_store %arg4[%c0_3, %c0_4], %3 {strides = array<i32>} : memref<2x256xf32, #tpu.memory_space<vmem>>, vector<2x256xf32>,
    return
  }
  func.func @transform_0(%arg0: i32, %arg1: i32) -> (i32, i32) {
    %c0_i32 = arith.constant 0 : i32
    return %arg1, %arg0 : i32, i32
  }
  func.func @transform_1(%arg0: i32, %arg1: i32) -> (i32, i32) {
    %c0_i32 = arith.constant 0 : i32
    %c0_i32_0 = arith.constant 0 : i32
    return %c0_i32, %arg0 : i32, i32
  }
  func.func @transform_2(%arg0: i32, %arg1: i32) -> (i32, i32) {
    %c0_i32 = arith.constant 0 : i32
    return %arg1, %arg0 : i32, i32
  }
}

</mosaic_0001>

<bundles_post_ra>
// kernel: tpu_custom_call.1
= control target key start
LH: loop header
LB: loop body
LE: loop exit
PB: predicated region body
PF: predicated region fallthrough
CT: control target
= control target key end

     0   :  { %7 = vsyncpa [#allocation3], 0  ;;  %s135_s0 = inlined_call_operand.hbm [shape: f32[2,256], index: 0, kind: input, shape index: {}, may-alias: {0,2}]   ;;  %s136_s1 = inlined_call_operand.vmem [shape: f32[1,256], index: 1, kind: input, shape index: {}]   ;;  %s137_s2 = inlined_call_operand.hbm [shape: f32[2,256], index: 2, kind: output, shape index: {}, may-alias: {0,2}]  }
   0x1   :  { %8 = vsyncpa [#allocation4], 0  ;;  %s108_s9 = smov [#allocation2]  }
   0x2   :  { %s15_s10 = sshll.u32 %s108_s9, 4  ;;  %s16_s10 = int_to_ptr.vmem [resolvable:$true] %s15_s10 }
   0x3   :  { %s72_s11 = scalar_lea.vmem %s16_s10, 64  ;;  %p77_p1 = scmp.lt.s32.totalorder %s16_s10, %s16_s10 }
   0x4   :  { %p73_p0 = scmp.ne.s32.totalorder %s16_s10, %s72_s11  ;;  %p78_p2 = scmp.lt.s32.totalorder %s72_s11, %s72_s11 }
   0x6   :  { %p79_p3 = por %p78_p2, %p77_p1 }
   0x8   :  { %p80_p4 = pnand %p79_p3, %p73_p0 }
   0xa   :  { %83 = shalt.err (!%p80_p4)
}
   0xb   :  { %18 = dma.hbm_to_vmem [thread:$0]  %s135_s0, 64, %s16_s10, [#allocation3]  }
   0xc   :  { %104 = dma.done.wait [#allocation3], 64  }
   0xd   :  { %105 = vsyncadd [#allocation3], 4294967232  ;;  %v27_v0 = vlaneseq  ;;  %v109_v1 = vmov 1983009808   ;;  %v25_v7 = vld [vmem:[%s136_s1] sm:$0x3] }
   0xe   :  { %v37_v2 = vunpack.c.l.s4 %v109_v1  ;;  %v24_v12 = vld [vmem:[#allocation2] sm:$0xf]  ;;  %s110_s16 = smov [#allocation5]  }
   0xf   :  { %v28_v3 = vshrl.u32 %v27_v0, 7  ;;  %s52_s0 = sshll.u32 %s110_s16, 4  ;;  %s53_s0 = int_to_ptr.vmem [resolvable:$true] %s52_s0 }
  0x10   :  { %v38_v6 = vunpack.c.0.s8 %v37_v2  ;;  %s84_s17 = scalar_lea.vmem %s53_s0, 64  ;;  %p89_p6 = scmp.lt.s32.totalorder %s53_s0, %s53_s0 }
  0x11   :  { %v29_v4 = vsub.s32 0, %v28_v3  ;;  %v33_v5 = vsub.s32 1, %v28_v3  ;;  %p85_p5 = scmp.ne.s32.totalorder %s53_s0, %s84_s17  ;;  %p90_p7 = scmp.lt.s32.totalorder %s84_s17, %s84_s17 }
  0x12   :  { %v41_v10 = vsub.s32 %v38_v6, %v28_v3 }
  0x13   :  { %v30_v8 = vrot.slane %v25_v7, %v29_v4  ;;  %v34_v9 = vrot.slane %v25_v7, %v33_v5  ;;  %p91_p8 = por %p90_p7, %p89_p6 }
  0x15   :  { %v35_v11 = vcombine.low %v30_v8, %v34_v9  ;;  %p92_p9 = pnand %p91_p8, %p85_p5 }
  0x17   :  { %v42_v13 = vrot.slane %v35_v11, %v41_v10 }
  0x19   :  { %v44_v14 = vadd.f32 %v42_v13, %v24_v12 }
  0x1b   :  { %45 = vst [vmem:[#allocation5] sm:$0xf] %v44_v14 }
  0x1c   :  { %95 = shalt.err (!%p92_p9)
}
  0x1d   :  { %55 = dma.vmem_to_hbm [thread:$0]  %s53_s0, 64, %s137_s2, [#allocation4]  }
  0x1e   :  { %106 = dma.done.wait [#allocation4], 64  }
  0x1f   :  { %107 = vsyncadd [#allocation4], 4294967232 }
  0x20   :  { %59 = vsyncpa [#allocation3], 1 }
  0x21   :  { %60 = vsyncpa [#allocation4], 1 }

</bundles_post_ra>
